<compile_context>
chip_gen: v7x
topology: tpu7x:2x2x1
jax: 0.10.0
libtpu: 0.0.40
codegen_flags: <defaults>
</compile_context>

<pallas_src>
import jax
import jax.numpy as jnp
from jax.experimental import pallas as pl
from jax.experimental.pallas import tpu as pltpu


def _round_up(x, m):
    return ((x + m - 1) // m) * m


def _choose_tm(batch):
    """Batch-tile size: single tile for small B, >=2 even-ish tiles for big B."""
    if batch <= 256:
        return _round_up(batch, 8)          # one grid step, minimal padding
    # Prefer >=2 grid steps (both v7x TensorCores get work), then minimal
    # padding waste, then the largest tile (amortizes per-step overhead).
    def key(tm):
        b_pad = _round_up(batch, tm)
        return (b_pad // tm < 2, b_pad - batch, -tm)
    return min((1024, 512, 256), key=key)


def actor_kernel(x_ref, w1_ref, b1_ref, w2_ref, b2_ref, w3_ref, b3_ref, o_ref):
    """Fused 3-layer MLP on one batch tile: relu(fc1) -> relu(fc2) -> tanh(fc3)."""
    x = x_ref[...].astype(jnp.bfloat16)                                  # in-kernel cast
    h1 = jnp.dot(x, w1_ref[...], preferred_element_type=jnp.float32)    # f32 acc
    h1 = jnp.maximum(h1 + b1_ref[...], 0.0).astype(jnp.bfloat16)        # f32 relu -> bf16
    h2 = jnp.dot(h1, w2_ref[...], preferred_element_type=jnp.float32)
    h2 = jnp.maximum(h2 + b2_ref[...], 0.0).astype(jnp.bfloat16)
    h3 = jnp.dot(h2, w3_ref[...], preferred_element_type=jnp.float32)   # (tm, 128) f32
    a = o_ref.shape[1]                                                   # real action width
    # Keep only the real action columns, add bias, tanh, compact store.
    o_ref[...] = jnp.tanh(h3[:, :a] + b3_ref[...]).astype(o_ref.dtype)


def prepare_actor_params(w1, b1, w2, b2, w3, b3):
    """One-time cast/pad of parameters for the kernel (call once, reuse).

    Weights are (in, out) and cast to bf16; w3 is zero-padded to 128 output
    lanes so the fc3 matmul stays MXU-shaped (the kernel only stores the real
    action columns).  Biases stay f32; b3 keeps its true width.
    """
    pad_n = _round_up(max(w3.shape[1], 128), 128)
    w3_p = jnp.pad(w3, ((0, 0), (0, pad_n - w3.shape[1])))
    return (
        w1.astype(jnp.bfloat16),
        b1.astype(jnp.float32),
        w2.astype(jnp.bfloat16),
        b2.astype(jnp.float32),
        w3_p.astype(jnp.bfloat16),
        b3.astype(jnp.float32),
    )


@jax.jit
def actor_forward(state, w1, b1, w2, b2, w3p, b3):
    """state: (B, state_size) f32.  Params as returned by prepare_actor_params.

    Returns (B, action_size) f32 = tanh(relu(relu(x@W1+b1)@W2+b2)@W3+b3).
    """
    B, state_size = state.shape
    fc1 = w1.shape[1]
    fc2 = w2.shape[1]
    action_size = b3.shape[1]

    tm = _choose_tm(B)
    B_pad = _round_up(B, tm)
    if B_pad != B:                                   # only when B % tm != 0
        state = jnp.pad(state, ((0, B_pad - B), (0, 0)))

    grid = (B_pad // tm,)

    def resident(shape):
        # Whole array stays VMEM-resident across all batch tiles.
        return pl.BlockSpec(shape, lambda i, _n=len(shape): (0,) * _n)

    flops = 2 * B_pad * (state_size * fc1 + fc1 * fc2 + fc2 * action_size)
    bytes_accessed = (
        state.size * 4
        + (w1.size + w2.size + w3p.size) * 2
        + (b1.size + b2.size + b3.size) * 4
        + B_pad * action_size * 4
    )
    cost = pl.CostEstimate(
        flops=flops,
        transcendentals=B_pad * action_size,   # tanh on the real columns only
        bytes_accessed=bytes_accessed,
    )

    out = pl.pallas_call(
        actor_kernel,
        out_shape=jax.ShapeDtypeStruct((B_pad, action_size), jnp.float32),
        grid_spec=pltpu.PrefetchScalarGridSpec(
            num_scalar_prefetch=0,
            grid=grid,
            in_specs=[
                pl.BlockSpec((tm, state_size), lambda i: (i, 0)),  # streamed per tile
                resident(w1.shape),
                resident(b1.shape),
                resident(w2.shape),
                resident(b2.shape),
                resident(w3p.shape),
                resident(b3.shape),
            ],
            out_specs=pl.BlockSpec((tm, action_size), lambda i: (i, 0)),
        ),
        compiler_params=pltpu.CompilerParams(
            dimension_semantics=("parallel",),   # megacore batch sharding on v7x
        ),
        cost_estimate=cost,
    )(state, w1, b1, w2, b2, w3p, b3)

    return out if B_pad == B else out[:B]


def init_actor_params(key, state_size, action_size, fc1_units=128, fc2_units=128):
    """Deterministic init mirroring Actor.reset_parameters().

    PyTorch hidden_init uses weight.size()[0] == out_features as "fan_in"
    (that is what the reference code does), so we replicate that exactly.
    Biases keep PyTorch's default Linear init: U(-1/sqrt(true_fan_in), ...).
    """
    k = jax.random.split(key, 6)

    def u(k_, shape, lim):
        return jax.random.uniform(k_, shape, jnp.float32, minval=-lim, maxval=lim)

    lim1 = 1.0 / jnp.sqrt(fc1_units)     # hidden_init uses weight.size()[0]
    lim2 = 1.0 / jnp.sqrt(fc2_units)
    lim3 = 0.003
    blim1 = 1.0 / jnp.sqrt(state_size)   # default bias init bound
    blim2 = 1.0 / jnp.sqrt(fc1_units)
    blim3 = 1.0 / jnp.sqrt(fc2_units)

    # Stored as (in, out) for the kernel (transpose of torch's (out, in)).
    w1 = u(k[0], (state_size, fc1_units), lim1)
    b1 = u(k[1], (1, fc1_units), blim1)
    w2 = u(k[2], (fc1_units, fc2_units), lim2)
    b2 = u(k[3], (1, fc2_units), blim2)
    w3 = u(k[4], (fc2_units, action_size), lim3)
    b3 = u(k[5], (1, action_size), blim3)
    return w1, b1, w2, b2, w3, b3


def actor_reference(state, w1, b1, w2, b2, w3, b3):
    h1 = jnp.maximum(state @ w1 + b1, 0.0)
    h2 = jnp.maximum(h1 @ w2 + b2, 0.0)
    return jnp.tanh(h2 @ w3 + b3)


if __name__ == "__main__":
    key = jax.random.PRNGKey(0)
    k_params, k_state = jax.random.split(key)

    batch = 8
    state_size = 32
    action_size = 4

    params = init_actor_params(k_params, state_size, action_size)
    kernel_params = prepare_actor_params(*params)   # one-time cast/pad
    state = jax.random.normal(k_state, (batch, state_size), jnp.float32)

    out = actor_forward(state, *kernel_params)
    out = jax.block_until_ready(out)

    ref = actor_reference(state, *params)
    assert out.shape == (batch, action_size), out.shape
    # bf16 matmul operands -> relaxed tolerance vs f32 reference.
    assert jnp.allclose(out, ref, atol=2e-2, rtol=2e-2), "mismatch vs reference"

    print("KERNEL_OK")
</pallas_src>

<mosaic_0001>
module attributes {stable_mosaic.version = 11 : i64} {
  func.func @actor_kernel(%arg0: i32, %arg1: memref<8x32xf32, #tpu.memory_space<vmem>>, %arg2: memref<32x128xbf16, #tpu.memory_space<vmem>>, %arg3: memref<1x128xf32, #tpu.memory_space<vmem>>, %arg4: memref<128x128xbf16, #tpu.memory_space<vmem>>, %arg5: memref<1x128xf32, #tpu.memory_space<vmem>>, %arg6: memref<128x128xbf16, #tpu.memory_space<vmem>>, %arg7: memref<1x4xf32, #tpu.memory_space<vmem>>, %arg8: memref<8x4xf32, #tpu.memory_space<vmem>>) attributes {dimension_semantics = [#tpu.dimension_semantics<parallel>], iteration_bounds = array<i64: 1>, scalar_prefetch = 0 : i64, scratch_operands = 0 : i64, tpu.core_type = #tpu.core_type<tc>, window_params = [{transform_indices = @transform_0, window_bounds = array<i64: 8, 32>}, {pipeline_mode = #tpu.pipeline_mode<synchronous>, transform_indices = @transform_1, window_bounds = array<i64: 32, 128>}, {pipeline_mode = #tpu.pipeline_mode<synchronous>, transform_indices = @transform_2, window_bounds = array<i64: 1, 128>}, {pipeline_mode = #tpu.pipeline_mode<synchronous>, transform_indices = @transform_3, window_bounds = array<i64: 128, 128>}, {pipeline_mode = #tpu.pipeline_mode<synchronous>, transform_indices = @transform_4, window_bounds = array<i64: 1, 128>}, {pipeline_mode = #tpu.pipeline_mode<synchronous>, transform_indices = @transform_5, window_bounds = array<i64: 128, 128>}, {pipeline_mode = #tpu.pipeline_mode<synchronous>, transform_indices = @transform_6, window_bounds = array<i64: 1, 4>}, {transform_indices = @transform_7, window_bounds = array<i64: 8, 4>}]} {
    %c0 = arith.constant 0 : index
    %c0_0 = arith.constant 0 : index
    %0 = vector.load %arg1[%c0, %c0_0] : memref<8x32xf32, #tpu.memory_space<vmem>>, vector<8x32xf32>
    %1 = arith.truncf %0 : vector<8x32xf32> to vector<8x32xbf16>
    %c0_1 = arith.constant 0 : index
    %c0_2 = arith.constant 0 : index
    %2 = vector.load %arg2[%c0_1, %c0_2] : memref<32x128xbf16, #tpu.memory_space<vmem>>, vector<32x128xbf16>
    %cst = arith.constant dense<0.000000e+00> : vector<8x128xf32>
    %3 = tpu.matmul %1, %2, %cst {dimension_numbers = #tpu.dot_dimension_numbers<[1], [0], [0], [1], [0, 0, 1, 1], [], []>} : vector<8x32xbf16>, vector<32x128xbf16>, vector<8x128xf32> -> vector<8x128xf32>
    %c0_3 = arith.constant 0 : index
    %c0_4 = arith.constant 0 : index
    %4 = vector.load %arg3[%c0_3, %c0_4] : memref<1x128xf32, #tpu.memory_space<vmem>>, vector<1x128xf32>
    %5 = vector.broadcast %4 : vector<1x128xf32> to vector<8x128xf32>
    %6 = arith.addf %3, %5 : vector<8x128xf32>
    %cst_5 = arith.constant 0.000000e+00 : f32
    %7 = vector.broadcast %cst_5 : f32 to vector<8x128xf32>
    %8 = arith.maximumf %6, %7 : vector<8x128xf32>
    %9 = arith.truncf %8 : vector<8x128xf32> to vector<8x128xbf16>
    %c0_6 = arith.constant 0 : index
    %c0_7 = arith.constant 0 : index
    %10 = vector.load %arg4[%c0_6, %c0_7] : memref<128x128xbf16, #tpu.memory_space<vmem>>, vector<128x128xbf16>
    %cst_8 = arith.constant dense<0.000000e+00> : vector<8x128xf32>
    %11 = tpu.matmul %9, %10, %cst_8 {dimension_numbers = #tpu.dot_dimension_numbers<[1], [0], [0], [1], [0, 0, 1, 1], [], []>} : vector<8x128xbf16>, vector<128x128xbf16>, vector<8x128xf32> -> vector<8x128xf32>
    %c0_9 = arith.constant 0 : index
    %c0_10 = arith.constant 0 : index
    %12 = vector.load %arg5[%c0_9, %c0_10] : memref<1x128xf32, #tpu.memory_space<vmem>>, vector<1x128xf32>
    %13 = vector.broadcast %12 : vector<1x128xf32> to vector<8x128xf32>
    %14 = arith.addf %11, %13 : vector<8x128xf32>
    %cst_11 = arith.constant 0.000000e+00 : f32
    %15 = vector.broadcast %cst_11 : f32 to vector<8x128xf32>
    %16 = arith.maximumf %14, %15 : vector<8x128xf32>
    %17 = arith.truncf %16 : vector<8x128xf32> to vector<8x128xbf16>
    %c0_12 = arith.constant 0 : index
    %c0_13 = arith.constant 0 : index
    %18 = vector.load %arg6[%c0_12, %c0_13] : memref<128x128xbf16, #tpu.memory_space<vmem>>, vector<128x128xbf16>
    %cst_14 = arith.constant dense<0.000000e+00> : vector<8x128xf32>
    %19 = tpu.matmul %17, %18, %cst_14 {dimension_numbers = #tpu.dot_dimension_numbers<[1], [0], [0], [1], [0, 0, 1, 1], [], []>} : vector<8x128xbf16>, vector<128x128xbf16>, vector<8x128xf32> -> vector<8x128xf32>
    %20 = vector.extract_strided_slice %19 {offsets = [0, 0], sizes = [8, 4], strides = [1, 1]} : vector<8x128xf32> to vector<8x4xf32>
    %c0_15 = arith.constant 0 : index
    %c0_16 = arith.constant 0 : index
    %21 = vector.load %arg7[%c0_15, %c0_16] : memref<1x4xf32, #tpu.memory_space<vmem>>, vector<1x4xf32>
    %22 = vector.broadcast %21 : vector<1x4xf32> to vector<8x4xf32>
    %23 = arith.addf %20, %22 : vector<8x4xf32>
    %24 = math.tanh %23 : vector<8x4xf32>
    %c0_17 = arith.constant 0 : index
    %c0_18 = arith.constant 0 : index
    %25 = vector.load %arg8[%c0_17, %c0_18] : memref<8x4xf32, #tpu.memory_space<vmem>>, vector<8x4xf32>
    tpu.vector_store %arg8[%c0_17, %c0_18], %24 {strides = array<i32>} : memref<8x4xf32, #tpu.memory_space<vmem>>, vector<8x4xf32>,
    return
  }
  func.func @transform_0(%arg0: i32) -> (i32, i32) {
    %c0_i32 = arith.constant 0 : i32
    %c0_i32_0 = arith.constant 0 : i32
    return %arg0, %c0_i32 : i32, i32
  }
  func.func @transform_1(%arg0: i32) -> (i32, i32) {
    %c0_i32 = arith.constant 0 : i32
    %c0_i32_0 = arith.constant 0 : i32
    %c0_i32_1 = arith.constant 0 : i32
    return %c0_i32, %c0_i32_0 : i32, i32
  }
  func.func @transform_2(%arg0: i32) -> (i32, i32) {
    %c0_i32 = arith.constant 0 : i32
    %c0_i32_0 = arith.constant 0 : i32
    %c0_i32_1 = arith.constant 0 : i32
    return %c0_i32, %c0_i32_0 : i32, i32
  }
  func.func @transform_3(%arg0: i32) -> (i32, i32) {
    %c0_i32 = arith.constant 0 : i32
    %c0_i32_0 = arith.constant 0 : i32
    %c0_i32_1 = arith.constant 0 : i32
    return %c0_i32, %c0_i32_0 : i32, i32
  }
  func.func @transform_4(%arg0: i32) -> (i32, i32) {
    %c0_i32 = arith.constant 0 : i32
    %c0_i32_0 = arith.constant 0 : i32
    %c0_i32_1 = arith.constant 0 : i32
    return %c0_i32, %c0_i32_0 : i32, i32
  }
  func.func @transform_5(%arg0: i32) -> (i32, i32) {
    %c0_i32 = arith.constant 0 : i32
    %c0_i32_0 = arith.constant 0 : i32
    %c0_i32_1 = arith.constant 0 : i32
    return %c0_i32, %c0_i32_0 : i32, i32
  }
  func.func @transform_6(%arg0: i32) -> (i32, i32) {
    %c0_i32 = arith.constant 0 : i32
    %c0_i32_0 = arith.constant 0 : i32
    %c0_i32_1 = arith.constant 0 : i32
    return %c0_i32, %c0_i32_0 : i32, i32
  }
  func.func @transform_7(%arg0: i32) -> (i32, i32) {
    %c0_i32 = arith.constant 0 : i32
    %c0_i32_0 = arith.constant 0 : i32
    return %arg0, %c0_i32 : i32, i32
  }
}

</mosaic_0001>

<bundles_post_ra>
// kernel: actor_forward.1
= control target key start
LH: loop header
LB: loop body
LE: loop exit
PB: predicated region body
PF: predicated region fallthrough
CT: control target
= control target key end

     0   :  { %12 = vsyncpa [#allocation3], 0  ;;  %s740_s0 = inlined_call_operand.hbm [shape: f32[8,32], index: 0, kind: input, shape index: {}]   ;;  %s741_s1 = inlined_call_operand.hbm [shape: bf16[32,128], index: 1, kind: input, shape index: {}]   ;;  %s742_s2 = inlined_call_operand.vmem [shape: f32[1,128], index: 2, kind: input, shape index: {}]   ;;  %s743_s3 = inlined_call_operand.hbm [shape: bf16[128,128], index: 3, kind: input, shape index: {}]   ;;  %s744_s4 = inlined_call_operand.vmem [shape: f32[1,128], index: 4, kind: input, shape index: {}]   ;;  %s745_s5 = inlined_call_operand.hbm [shape: bf16[128,128], index: 5, kind: input, shape index: {}]   ;;  %s746_s6 = inlined_call_operand.vmem [shape: f32[1,4], index: 6, kind: input, shape index: {}]   ;;  %s747_s7 = inlined_call_operand.vmem [shape: f32[8,4], index: 7, kind: output, shape index: {}]  }
   0x1   :  { %13 = vsyncpa [#allocation5], 0 }
   0x2   :  { %14 = vsyncpa [#allocation8], 0  ;;  %s599_s24 = smov [#allocation4]   ;;  %s505_s28 = scalar_lea.hbm %s741_s1, 256 }
   0x3   :  { %s30_s25 = sshll.u32 %s599_s24, 4  ;;  %p506_p0 = scmp.ne.s32.totalorder %s741_s1, %s505_s28  ;;  %s31_s25 = int_to_ptr.vmem [resolvable:$true] %s30_s25 }
   0x4   :  { %p509_p1 = scmp.lt.u32.totalorder %s505_s28, %s741_s1 }
   0x6   :  { %p511_p2 = pnand %p509_p1, %p506_p0 }
   0x8   :  { %514 = shalt.err (!%p511_p2)
}
   0x9   :  { %s515_s10 = scalar_lea.vmem %s31_s25, 256  ;;  %p520_p4 = scmp.lt.s32.totalorder %s31_s25, %s31_s25 }
   0xa   :  { %p516_p3 = scmp.ne.s32.totalorder %s31_s25, %s515_s10  ;;  %p521_p5 = scmp.lt.s32.totalorder %s515_s10, %s515_s10 }
   0xc   :  { %p522_p6 = por %p521_p5, %p520_p4 }
   0xe   :  { %p523_p7 = pnand %p522_p6, %p516_p3 }
  0x10   :  { %526 = shalt.err (!%p523_p7)
}
  0x11   :  { %s600_s11 = smov 64   ;;  %s601_s12 = smov 4  }
  0x12   :  { %36 = dma.hbm_to_vmem [thread:$0]  %s741_s1, 256, %s31_s25, [#allocation5], %s600_s11, %s600_s11, %s601_s12  }
  0x13   :  { %s602_s15 = smov [#allocation2]   ;;  %s603_s17 = smov [#allocation6]  }
  0x14   :  { %s21_s16 = sshll.u32 %s602_s15, 4  ;;  %s44_s18 = sshll.u32 %s603_s17, 4  ;;  %s22_s16 = int_to_ptr.vmem [resolvable:$true] %s21_s16  ;;  %s45_s18 = int_to_ptr.vmem [resolvable:$true] %s44_s18 }
  0x15   :  { %s527_s21 = scalar_lea.hbm %s740_s0, 128 }
  0x16   :  { %p528_p8 = scmp.ne.s32.totalorder %s740_s0, %s527_s21  ;;  %p531_p9 = scmp.lt.u32.totalorder %s527_s21, %s740_s0 }
  0x18   :  { %p533_p10 = pnand %p531_p9, %p528_p8 }
  0x1a   :  { %536 = shalt.err (!%p533_p10)
}
  0x1b   :  { %s537_s1 = scalar_lea.vmem %s22_s16, 128  ;;  %p542_p12 = scmp.lt.s32.totalorder %s22_s16, %s22_s16 }
  0x1c   :  { %p538_p11 = scmp.ne.s32.totalorder %s22_s16, %s537_s1  ;;  %p543_p13 = scmp.lt.s32.totalorder %s537_s1, %s537_s1 }
  0x1e   :  { %p544_p0 = por %p543_p13, %p542_p12 }
  0x20   :  { %p545_p1 = pnand %p544_p0, %p538_p11 }
  0x22   :  { %548 = shalt.err (!%p545_p1)
}
  0x23   :  { %24 = dma.hbm_to_vmem [thread:$0]  %s740_s0, 128, %s22_s16, [#allocation3]  }
  0x24   :  { %s549_s30 = scalar_lea.hbm %s743_s3, 1024 }
  0x25   :  { %p550_p2 = scmp.ne.s32.totalorder %s743_s3, %s549_s30  ;;  %p553_p3 = scmp.lt.u32.totalorder %s549_s30, %s743_s3 }
  0x27   :  { %p555_p4 = pnand %p553_p3, %p550_p2 }
  0x29   :  { %558 = shalt.err (!%p555_p4)
}
  0x2a   :  { %s559_s14 = scalar_lea.vmem %s45_s18, 1024  ;;  %p564_p6 = scmp.lt.s32.totalorder %s45_s18, %s45_s18 }
  0x2b   :  { %p560_p5 = scmp.ne.s32.totalorder %s45_s18, %s559_s14  ;;  %p565_p7 = scmp.lt.s32.totalorder %s559_s14, %s559_s14 }
  0x2d   :  { %p566_p8 = por %p565_p7, %p564_p6 }
  0x2f   :  { %p567_p9 = pnand %p566_p8, %p560_p5 }
  0x31   :  { %570 = shalt.err (!%p567_p9)
}
  0x32   :  { %50 = dma.hbm_to_vmem [thread:$0]  %s743_s3, 1024, %s45_s18, [#allocation5], %s600_s11, %s600_s11, %s601_s12  }
  0x33   :  { %s604_s16 = smov [#allocation7]   ;;  %s571_s21 = scalar_lea.hbm %s745_s5, 1024 }
  0x34   :  { %s58_s17 = sshll.u32 %s604_s16, 4  ;;  %p572_p10 = scmp.ne.s32.totalorder %s745_s5, %s571_s21  ;;  %s59_s17 = int_to_ptr.vmem [resolvable:$true] %s58_s17 }
  0x35   :  { %p575_p11 = scmp.lt.u32.totalorder %s571_s21, %s745_s5 }
  0x37   :  { %p577_p12 = pnand %p575_p11, %p572_p10 }
  0x39   :  { %580 = shalt.err (!%p577_p12)
}
  0x3a   :  { %s581_s1 = scalar_lea.vmem %s59_s17, 1024  ;;  %p586_p0 = scmp.lt.s32.totalorder %s59_s17, %s59_s17 }
  0x3b   :  { %p582_p13 = scmp.ne.s32.totalorder %s59_s17, %s581_s1  ;;  %p587_p1 = scmp.lt.s32.totalorder %s581_s1, %s581_s1 }
  0x3d   :  { %p588_p2 = por %p587_p1, %p586_p0 }
  0x3f   :  { %p589_p3 = pnand %p588_p2, %p582_p13 }
  0x41   :  { %592 = shalt.err (!%p589_p3)
}
  0x42   :  { %64 = dma.hbm_to_vmem [thread:$0]  %s745_s5, 1024, %s59_s17, [#allocation8], %s600_s11, %s600_s11, %s601_s12  }
  0x43   :  { %593 = dma.done.wait [#allocation3], 128  }
  0x44   :  { %594 = vsyncadd [#allocation3], 4294967168 }
  0x45   :  { %595 = dma.done.wait [#allocation5], 1280  }
  0x46   :  { %596 = vsyncadd [#allocation5], 4294966016 }
  0x47   :  { %597 = dma.done.wait [#allocation8], 1024  }
  0x48   :  { %598 = vsyncadd [#allocation8], 4294966272  ;;  %v605_v0 = vmov 0.0   ;;  %vm606_vm0 = vmmov 0   ;;  %v485_v1 = vld [vmem:[#allocation4] sm:$0xff]   ;;  %v486_v2 = vld [vmem:[#allocation4 + $0x8] sm:$0xff]  }
  0x49   :  { %429 = vmatprep.subr.bf16.mxu0 %v605_v0  ;;  %433 = vmatprep.mubr.msk.bf16.mxu0 %vm606_vm0, %v605_v0  ;;  %v80_v3 = vld [vmem:[#allocation2] sm:$0xff]  ;;  %v487_v4 = vld [vmem:[#allocation6] sm:$0xff]   ;;  %vm105_vm1 = vcmask 261120   ;;  %v489_v7 = vld [vmem:[#allocation6 + $0x10] sm:$0xff]   ;;  %vm377_vm2 = vcmask 31744  }
  0x4a   :  { %437 = vmatprep.subr.bf16.mxu1 %v605_v0  ;;  %453 = vmatprep.mubr.msk.bf16.mxu1 %vm606_vm0, %v605_v0  ;;  %v81_v5 = vpack.c.bf16 %v80_v3, %v80_v3  ;;  %v488_v6 = vld [vmem:[#allocation6 + $0x8] sm:$0xff]   ;;  %v490_v8 = vld [vmem:[#allocation6 + $0x18] sm:$0xff]   ;;  %v491_v9 = vld [vmem:[#allocation6 + $0x20] sm:$0xff]  }
  0x4b   :  { %430 = vmatpush3.bf16.msra.mxu0 %v485_v1  ;;  %438 = vmatpush3.bf16.msra.mxu1 %v487_v4  ;;  %v492_v10 = vld [vmem:[#allocation6 + $0x28] sm:$0xff]   ;;  %v493_v11 = vld [vmem:[#allocation6 + $0x30] sm:$0xff]   ;;  %v494_v12 = vld [vmem:[#allocation6 + $0x38] sm:$0xff]  }
  0x4c   :  { %431 = vmatprep.subr.bf16.mxu0 %v605_v0  ;;  %439 = vmatprep.subr.bf16.mxu1 %v605_v0  ;;  %v495_v13 = vld [vmem:[#allocation7] sm:$0xff]   ;;  %v496_v14 = vld [vmem:[#allocation7 + $0x8] sm:$0xff]   ;;  %v497_v15 = vld [vmem:[#allocation7 + $0x10] sm:$0xff]  }
  0x4d   :  { %v498_v16 = vld [vmem:[#allocation7 + $0x18] sm:$0xff]   ;;  %v499_v17 = vld [vmem:[#allocation7 + $0x20] sm:$0xff]   ;;  %v500_v18 = vld [vmem:[#allocation7 + $0x28] sm:$0xff]  }
  0x4e   :  { %v386_v19 = vld [vmem:[%s742_s2] ss:$0 sm:$0xff]  ;;  %v501_v27 = vld [vmem:[#allocation7 + $0x30] sm:$0xff]   ;;  %v502_v28 = vld [vmem:[#allocation7 + $0x38] sm:$0xff]  }
  0x4f   :  { %432 = vmatpush3.bf16.msra.mxu0 %v486_v2  ;;  %440 = vmatpush3.bf16.msra.mxu1 %v488_v6  ;;  %v390_v29 = vld [vmem:[%s744_s4] ss:$0 sm:$0xff] }
  0x50   :  { %457 = vmatprep.subr.bf16.mxu0 %v605_v0  ;;  %441 = vmatprep.subr.bf16.mxu1 %v605_v0  ;;  %v407_v37 = vld [vmem:[%s746_s6] ss:$0 sm:$0xff] }
  0x52   :  { %434 = vmatmul.mubr.msk.bf16.vlgmr.msra.gmra.mrb[0].mxu0 %vm105_vm1, %v81_v5 }
  0x53   :  { %473 = vmatprep.mubr.msk.bf16.mxu0 %vm606_vm0, %v605_v0  ;;  %442 = vmatpush3.bf16.msra.mxu1 %v489_v7 }
  0x54   :  { %443 = vmatprep.subr.bf16.mxu1 %v605_v0  ;;  %458 = vmatpush3.bf16.msra.mxu0 %v495_v13 }
  0x55   :  { %459 = vmatprep.subr.bf16.mxu0 %v605_v0 }
  0x57   :  { %444 = vmatpush3.bf16.msra.mxu1 %v490_v8 }
  0x58   :  { %445 = vmatprep.subr.bf16.mxu1 %v605_v0  ;;  %460 = vmatpush3.bf16.msra.mxu0 %v496_v14 }
  0x59   :  { %461 = vmatprep.subr.bf16.mxu0 %v605_v0 }
  0x5b   :  { %446 = vmatpush3.bf16.msra.mxu1 %v491_v9 }
  0x5c   :  { %447 = vmatprep.subr.bf16.mxu1 %v605_v0  ;;  %462 = vmatpush3.bf16.msra.mxu0 %v497_v15 }
  0x5d   :  { %463 = vmatprep.subr.bf16.mxu0 %v605_v0 }
  0x5f   :  { %448 = vmatpush3.bf16.msra.mxu1 %v492_v10 }
  0x60   :  { %449 = vmatprep.subr.bf16.mxu1 %v605_v0  ;;  %464 = vmatpush3.bf16.msra.mxu0 %v498_v16 }
  0x61   :  { %465 = vmatprep.subr.bf16.mxu0 %v605_v0 }
  0x63   :  { %450 = vmatpush3.bf16.msra.mxu1 %v493_v11 }
  0x64   :  { %451 = vmatprep.subr.bf16.mxu1 %v605_v0  ;;  %466 = vmatpush3.bf16.msra.mxu0 %v499_v17 }
  0x65   :  { %467 = vmatprep.subr.bf16.mxu0 %v605_v0 }
  0x67   :  { %452 = vmatpush3.bf16.msra.mxu1 %v494_v12 }
  0x68   :  { %468 = vmatpush3.bf16.msra.mxu0 %v500_v18 }
  0x69   :  { %469 = vmatprep.subr.bf16.mxu0 %v605_v0 }
  0x6c   :  { %470 = vmatpush3.bf16.msra.mxu0 %v501_v27 }
  0x6d   :  { %471 = vmatprep.subr.bf16.mxu0 %v605_v0 }
  0x70   :  { %472 = vmatpush3.bf16.msra.mxu0 %v502_v28 }
 0x125   :  { %v143_v20 = vpop.f32.mrb[0].mxu0 }
 0x126   :  { %v144_v21 = vadd.f32 %v386_v19, %v143_v20  ;;  %v435_v22 = vpop.f32.mrb[1].mxu0 }
 0x127   :  { %v146_v23 = vpop.f32.mrb[2].mxu0 }
 0x128   :  { %v149_v24 = vmax.f32 %v144_v21, 0.0  ;;  %v436_v25 = vpop.f32.mrb[3].mxu0 }
 0x12a   :  { %v150_v26 = vpack.c.bf16 %v149_v24, %v149_v24 }
 0x12c   :  { %454 = vmatmul.mubr.bf16.vlgmr.msra.gmra.mrb[0].mxu1 %v150_v26 }
 0x1ff   :  { %v256_v30 = vpop.f32.mrb[0].mxu1 }
 0x200   :  { %v257_v31 = vadd.f32 %v390_v29, %v256_v30  ;;  %v455_v32 = vpop.f32.mrb[1].mxu1 }
 0x201   :  { %v259_v33 = vpop.f32.mrb[2].mxu1 }
 0x202   :  { %v262_v34 = vmax.f32 %v257_v31, 0.0  ;;  %v456_v35 = vpop.f32.mrb[3].mxu1 }
 0x204   :  { %v263_v36 = vpack.c.bf16 %v262_v34, %v262_v34 }
 0x206   :  { %474 = vmatmul.mubr.bf16.vlgmr.msra.gmra.mrb[4].mxu0 %v263_v36 }
 0x2d9   :  { %v362_v38 = vpop.f32.mrb[4].mxu0 }
 0x2da   :  { %v375_v39 = vadd.f32 %v407_v37, %v362_v38  ;;  %v475_v40 = vpop.f32.mrb[5].mxu0 }
 0x2db   :  { %v365_v41 = vpop.f32.mrb[6].mxu0 }
 0x2dc   :  { %503 = vtanh.f32 %v375_v39  ;;  %v476_v42 = vpop.f32.mrb[7].mxu0 }
 0x2e6   :  { %v504_v43 = vpop.eup %503 }
 0x2e7   :  { %378 = vst.msk [vmem:[%s747_s7] sm:$0xff] %vm377_vm2, %v504_v43 }
 0x2e8   :  { %383 = vsyncpa [#allocation3], 1 }
 0x2e9   :  { %384 = vsyncpa [#allocation5], 1 }
 0x2ea   :  { %385 = vsyncpa [#allocation8], 1 }

</bundles_post_ra>
